<compile_context>
chip_gen: v6e
topology: v6e:2x2x1
jax: 0.10.0
libtpu: 0.0.40
codegen_flags: <defaults>
</compile_context>

<pallas_src>
import jax
import jax.numpy as jnp
from jax import lax
from jax.experimental import pallas as pl
from jax.experimental.pallas import tpu as pltpu

THRESHOLD = 2.0


def _round_up(a, b):
    return (a + b - 1) // b * b


# ---------------------------------------------------------------------------
# Pallas kernel: in-kernel 3x3 taps (9 shifted matmuls) + closed-form IF epilogue
# ---------------------------------------------------------------------------
def _make_kernel(sim_length: int, use_spike: bool, wp: int, r_pad: int):
    a = float(sim_length) / THRESHOLD        # T / threshold
    c = 1.0 / (2.0 * float(sim_length))      # mem0 / threshold = 1 / (2T)
    t_f = float(sim_length)

    def kernel(x_ref, w_ref, b_ref, o_ref):
        # x_ref: (Cin, P)        bf16  flattened zero-padded image (1 leading pad lane)
        # w_ref: (9, Cout, Cin)  bf16  per-tap weights, full array in VMEM (grid-invariant)
        # b_ref: (Cout, 1)       f32   full array in VMEM (grid-invariant)
        # o_ref: (Cout, R_pad)   bf16 (spike) / f32 (conv), lane-dense output tile
        cout = o_ref.shape[0]
        acc = jnp.zeros((cout, r_pad), dtype=jnp.float32)
        for kh in range(3):
            for kw in range(3):
                s = kh * wp + kw                          # static lane offset of this tap
                acc = acc + jnp.dot(w_ref[kh * 3 + kw],
                                    x_ref[:, s:s + r_pad],
                                    preferred_element_type=jnp.float32)
        acc = acc + b_ref[...]                            # bias / spike math stay f32
        if use_spike:
            # Exact closed form of the T-step soft-reset IF recurrence (constant input).
            n_spk = jnp.clip(jnp.floor(acc * a + c), 0.0, t_f)
            o_ref[...] = (THRESHOLD * n_spk).astype(o_ref.dtype)
        else:                                             # StraightThrough path
            o_ref[...] = acc.astype(o_ref.dtype)

    return kernel


# ---------------------------------------------------------------------------
# Wrapper: bf16 zero-pad + flatten (no im2col), pallas_call, un-pad
# ---------------------------------------------------------------------------
def spike_model_forward(x, weight, bias, sim_length, use_spike=True):
    """SpikeModel(Conv2d(3x3, stride=1, pad=1)) forward.

    x:      (N, Cin, H, W)  float32, NCHW (PyTorch convention)
    weight: (Cout, Cin, 3, 3)
    bias:   (Cout,)
    returns (N, Cout, H, W) float32
    """
    N, Cin, H, W = x.shape
    Cout = weight.shape[0]
    Hp, Wp = H + 2, W + 2
    R = H * Wp                                   # output rows H, padded columns Wp (lane-dense)
    R_pad = _round_up(R, 128)
    P = _round_up(R_pad + 2 * Wp + 2, 128)       # covers max tap slice start (2*Wp+2) + R_pad

    # Preprocessing entirely in bf16: zero-pad spatially, flatten, add 1 leading pad lane
    # so every tap slice start (kh*Wp + kw, kw-1 >= -1) is non-negative.
    xb = x.astype(jnp.bfloat16)
    xp = jnp.pad(xb, ((0, 0), (0, 0), (1, 1), (1, 1)))               # (N, Cin, Hp, Wp)
    xs = jnp.pad(xp.reshape(N, Cin, Hp * Wp),
                 ((0, 0), (0, 0), (1, P - Hp * Wp - 1)))             # (N, Cin, P)

    w9 = jnp.transpose(weight, (2, 3, 0, 1)).reshape(9, Cout, Cin).astype(jnp.bfloat16)
    b2 = bias.reshape(Cout, 1).astype(jnp.float32)

    out_dtype = jnp.bfloat16 if use_spike else jnp.float32
    out_bytes = 2 if use_spike else 4

    # VMEM budget: double-buffered x/out blocks + single-copy weights/bias, with headroom,
    # clamped to stay inside v7x's 64 MiB physical VMEM.
    need = (2 * Cin * P * 2) + (2 * Cout * R_pad * out_bytes) + (9 * Cout * Cin * 2) + Cout * 4
    vmem_limit = int(min(max(2 * need + (4 << 20), 32 << 20), 64 << 20))

    kernel = _make_kernel(sim_length, use_spike, Wp, R_pad)

    out = pl.pallas_call(
        kernel,
        out_shape=jax.ShapeDtypeStruct((N, Cout, R_pad), out_dtype),
        grid_spec=pltpu.PrefetchScalarGridSpec(
            num_scalar_prefetch=0,
            grid=(N,),
            in_specs=[
                pl.BlockSpec((None, Cin, P), lambda n: (n, 0, 0)),
                # grid-invariant operands: whole array in VMEM, single copy, no pipelining
                pl.BlockSpec(memory_space=pltpu.MemorySpace.VMEM),
                pl.BlockSpec(memory_space=pltpu.MemorySpace.VMEM),
            ],
            out_specs=pl.BlockSpec((None, Cout, R_pad), lambda n: (n, 0, 0)),
        ),
        compiler_params=pltpu.CompilerParams(
            dimension_semantics=("parallel",),       # batch axis -> megacore / dual-TC
            vmem_limit_bytes=vmem_limit,
        ),
    )(xs, w9, b2)

    # (N, Cout, R_pad) -> drop lane padding and the 2 junk (spatial-pad) columns -> NCHW.
    out = out[:, :, :R].reshape(N, Cout, H, Wp)[:, :, :, 1:W + 1]
    return out.astype(jnp.float32)


# ---------------------------------------------------------------------------
# Pure-JAX references (mirror the PyTorch semantics)
# ---------------------------------------------------------------------------
def _conv_reference(x, weight, bias):
    return lax.conv_general_dilated(
        x.astype(jnp.float32), weight.astype(jnp.float32),
        window_strides=(1, 1), padding=((1, 1), (1, 1)),
        dimension_numbers=("NCHW", "OIHW", "NCHW"),
    ) + bias.reshape(1, -1, 1, 1).astype(jnp.float32)


def _spike_loop_reference(conv_out, sim_length):
    """The literal PyTorch T-step loop applied to a given conv output."""
    mem = jnp.full_like(conv_out, THRESHOLD / 2.0 / sim_length)
    out = jnp.zeros_like(conv_out)
    for _ in range(sim_length):
        mem = mem + conv_out
        spike = (mem >= THRESHOLD).astype(jnp.float32) * THRESHOLD
        mem = mem - spike
        out = out + spike
    return out


# ---------------------------------------------------------------------------
if __name__ == "__main__":
    key = jax.random.PRNGKey(0)
    k_x, k_w, k_b = jax.random.split(key, 3)

    N, Cin, H, W = 2, 4, 16, 16
    Cout = 8
    T = 8                                             # sim_length

    x = jax.random.normal(k_x, (N, Cin, H, W), dtype=jnp.float32)
    weight = jax.random.normal(k_w, (Cout, Cin, 3, 3), dtype=jnp.float32) * 0.3
    bias = jax.random.normal(k_b, (Cout,), dtype=jnp.float32) * 0.1

    # --- non-spike (StraightThrough) path: plain conv (bf16 operand tolerance) ---
    out_conv = jax.block_until_ready(
        spike_model_forward(x, weight, bias, sim_length=T, use_spike=False))
    ref_conv = _conv_reference(x, weight, bias)
    assert out_conv.shape == (N, Cout, H, W)
    assert jnp.allclose(out_conv, ref_conv, atol=5e-2, rtol=5e-2), "conv mismatch"

    # --- spike path ---
    out_spike = jax.block_until_ready(
        spike_model_forward(x, weight, bias, sim_length=T, use_spike=True))
    assert out_spike.shape == (N, Cout, H, W)

    # Compare against the PyTorch-style T-step loop applied to the kernel's own conv
    # output, isolating the spiking recurrence from bf16 operand rounding.  Values landing
    # exactly on a firing boundary can flip one spike level between the closed-form and
    # iterative evaluation orders; tolerate at most a handful of 1-spike flips.
    ref_spike = _spike_loop_reference(out_conv, T)
    diff = jnp.abs(out_spike - ref_spike)
    assert float(jnp.max(diff)) <= THRESHOLD + 1e-3, "spike mismatch larger than 1 spike"
    n_flip = int(jnp.sum(diff > 1e-3))
    assert n_flip <= max(4, out_spike.size // 500), f"too many spike flips: {n_flip}"

    # End-to-end sanity vs the full f32 reference (conv + loop): bf16 operand rounding can
    # shift an element by at most one spike level.
    ref_full = _spike_loop_reference(ref_conv, T)
    assert float(jnp.max(jnp.abs(out_spike - ref_full))) <= THRESHOLD + 1e-3

    print("KERNEL_OK")
</pallas_src>

<mosaic_0001>
module attributes {stable_mosaic.version = 11 : i64} {
  func.func @kernel(%arg0: i32, %arg1: memref<1x4x512xbf16, #tpu.memory_space<vmem>>, %arg2: memref<9x8x4xbf16, #tpu.memory_space<vmem>>, %arg3: memref<8x1xf32, #tpu.memory_space<vmem>>, %arg4: memref<1x8x384xf32, #tpu.memory_space<vmem>>) attributes {dimension_semantics = [#tpu.dimension_semantics<parallel>], iteration_bounds = array<i64: 2>, scalar_prefetch = 0 : i64, scratch_operands = 0 : i64, tpu.core_type = #tpu.core_type<tc>, window_params = [{transform_indices = @transform_0, window_bounds = array<i64: 1, 4, 512>}, {pipeline_mode = #tpu.pipeline_mode<synchronous>, transform_indices = @transform_1, window_bounds = array<i64: 9, 8, 4>}, {pipeline_mode = #tpu.pipeline_mode<synchronous>, transform_indices = @transform_2, window_bounds = array<i64: 8, 1>}, {transform_indices = @transform_3, window_bounds = array<i64: 1, 8, 384>}]} {
    %cst = arith.constant 0.000000e+00 : f32
    %0 = vector.broadcast %cst : f32 to vector<8x384xf32>
    %c0 = arith.constant 0 : index
    %c0_0 = arith.constant 0 : index
    %c0_1 = arith.constant 0 : index
    %1 = vector.load %arg2[%c0, %c0_0, %c0_1] : memref<9x8x4xbf16, #tpu.memory_space<vmem>>, vector<1x8x4xbf16>
    %2 = vector.shape_cast %1 : vector<1x8x4xbf16> to vector<8x4xbf16>
    %c0_2 = arith.constant 0 : index
    %c0_3 = arith.constant 0 : index
    %c0_4 = arith.constant 0 : index
    %3 = vector.load %arg1[%c0_2, %c0_3, %c0_4] : memref<1x4x512xbf16, #tpu.memory_space<vmem>>, vector<1x4x384xbf16>
    %4 = vector.shape_cast %3 : vector<1x4x384xbf16> to vector<4x384xbf16>
    %cst_5 = arith.constant dense<0.000000e+00> : vector<8x384xf32>
    %5 = tpu.matmul %2, %4, %cst_5 {dimension_numbers = #tpu.dot_dimension_numbers<[1], [0], [0], [1], [0, 0, 1, 1], [], []>} : vector<8x4xbf16>, vector<4x384xbf16>, vector<8x384xf32> -> vector<8x384xf32>
    %6 = arith.addf %0, %5 : vector<8x384xf32>
    %c1 = arith.constant 1 : index
    %c0_6 = arith.constant 0 : index
    %c0_7 = arith.constant 0 : index
    %7 = vector.load %arg2[%c1, %c0_6, %c0_7] : memref<9x8x4xbf16, #tpu.memory_space<vmem>>, vector<1x8x4xbf16>
    %8 = vector.shape_cast %7 : vector<1x8x4xbf16> to vector<8x4xbf16>
    %c0_8 = arith.constant 0 : index
    %c0_9 = arith.constant 0 : index
    %c1_10 = arith.constant 1 : index
    %9 = vector.load %arg1[%c0_8, %c0_9, %c1_10] : memref<1x4x512xbf16, #tpu.memory_space<vmem>>, vector<1x4x384xbf16>
    %10 = vector.shape_cast %9 : vector<1x4x384xbf16> to vector<4x384xbf16>
    %cst_11 = arith.constant dense<0.000000e+00> : vector<8x384xf32>
    %11 = tpu.matmul %8, %10, %cst_11 {dimension_numbers = #tpu.dot_dimension_numbers<[1], [0], [0], [1], [0, 0, 1, 1], [], []>} : vector<8x4xbf16>, vector<4x384xbf16>, vector<8x384xf32> -> vector<8x384xf32>
    %12 = arith.addf %6, %11 : vector<8x384xf32>
    %c2 = arith.constant 2 : index
    %c0_12 = arith.constant 0 : index
    %c0_13 = arith.constant 0 : index
    %13 = vector.load %arg2[%c2, %c0_12, %c0_13] : memref<9x8x4xbf16, #tpu.memory_space<vmem>>, vector<1x8x4xbf16>
    %14 = vector.shape_cast %13 : vector<1x8x4xbf16> to vector<8x4xbf16>
    %c0_14 = arith.constant 0 : index
    %c0_15 = arith.constant 0 : index
    %c2_16 = arith.constant 2 : index
    %15 = vector.load %arg1[%c0_14, %c0_15, %c2_16] : memref<1x4x512xbf16, #tpu.memory_space<vmem>>, vector<1x4x384xbf16>
    %16 = vector.shape_cast %15 : vector<1x4x384xbf16> to vector<4x384xbf16>
    %cst_17 = arith.constant dense<0.000000e+00> : vector<8x384xf32>
    %17 = tpu.matmul %14, %16, %cst_17 {dimension_numbers = #tpu.dot_dimension_numbers<[1], [0], [0], [1], [0, 0, 1, 1], [], []>} : vector<8x4xbf16>, vector<4x384xbf16>, vector<8x384xf32> -> vector<8x384xf32>
    %18 = arith.addf %12, %17 : vector<8x384xf32>
    %c3 = arith.constant 3 : index
    %c0_18 = arith.constant 0 : index
    %c0_19 = arith.constant 0 : index
    %19 = vector.load %arg2[%c3, %c0_18, %c0_19] : memref<9x8x4xbf16, #tpu.memory_space<vmem>>, vector<1x8x4xbf16>
    %20 = vector.shape_cast %19 : vector<1x8x4xbf16> to vector<8x4xbf16>
    %c0_20 = arith.constant 0 : index
    %c0_21 = arith.constant 0 : index
    %c18 = arith.constant 18 : index
    %21 = vector.load %arg1[%c0_20, %c0_21, %c18] : memref<1x4x512xbf16, #tpu.memory_space<vmem>>, vector<1x4x384xbf16>
    %22 = vector.shape_cast %21 : vector<1x4x384xbf16> to vector<4x384xbf16>
    %cst_22 = arith.constant dense<0.000000e+00> : vector<8x384xf32>
    %23 = tpu.matmul %20, %22, %cst_22 {dimension_numbers = #tpu.dot_dimension_numbers<[1], [0], [0], [1], [0, 0, 1, 1], [], []>} : vector<8x4xbf16>, vector<4x384xbf16>, vector<8x384xf32> -> vector<8x384xf32>
    %24 = arith.addf %18, %23 : vector<8x384xf32>
    %c4 = arith.constant 4 : index
    %c0_23 = arith.constant 0 : index
    %c0_24 = arith.constant 0 : index
    %25 = vector.load %arg2[%c4, %c0_23, %c0_24] : memref<9x8x4xbf16, #tpu.memory_space<vmem>>, vector<1x8x4xbf16>
    %26 = vector.shape_cast %25 : vector<1x8x4xbf16> to vector<8x4xbf16>
    %c0_25 = arith.constant 0 : index
    %c0_26 = arith.constant 0 : index
    %c19 = arith.constant 19 : index
    %27 = vector.load %arg1[%c0_25, %c0_26, %c19] : memref<1x4x512xbf16, #tpu.memory_space<vmem>>, vector<1x4x384xbf16>
    %28 = vector.shape_cast %27 : vector<1x4x384xbf16> to vector<4x384xbf16>
    %cst_27 = arith.constant dense<0.000000e+00> : vector<8x384xf32>
    %29 = tpu.matmul %26, %28, %cst_27 {dimension_numbers = #tpu.dot_dimension_numbers<[1], [0], [0], [1], [0, 0, 1, 1], [], []>} : vector<8x4xbf16>, vector<4x384xbf16>, vector<8x384xf32> -> vector<8x384xf32>
    %30 = arith.addf %24, %29 : vector<8x384xf32>
    %c5 = arith.constant 5 : index
    %c0_28 = arith.constant 0 : index
    %c0_29 = arith.constant 0 : index
    %31 = vector.load %arg2[%c5, %c0_28, %c0_29] : memref<9x8x4xbf16, #tpu.memory_space<vmem>>, vector<1x8x4xbf16>
    %32 = vector.shape_cast %31 : vector<1x8x4xbf16> to vector<8x4xbf16>
    %c0_30 = arith.constant 0 : index
    %c0_31 = arith.constant 0 : index
    %c20 = arith.constant 20 : index
    %33 = vector.load %arg1[%c0_30, %c0_31, %c20] : memref<1x4x512xbf16, #tpu.memory_space<vmem>>, vector<1x4x384xbf16>
    %34 = vector.shape_cast %33 : vector<1x4x384xbf16> to vector<4x384xbf16>
    %cst_32 = arith.constant dense<0.000000e+00> : vector<8x384xf32>
    %35 = tpu.matmul %32, %34, %cst_32 {dimension_numbers = #tpu.dot_dimension_numbers<[1], [0], [0], [1], [0, 0, 1, 1], [], []>} : vector<8x4xbf16>, vector<4x384xbf16>, vector<8x384xf32> -> vector<8x384xf32>
    %36 = arith.addf %30, %35 : vector<8x384xf32>
    %c6 = arith.constant 6 : index
    %c0_33 = arith.constant 0 : index
    %c0_34 = arith.constant 0 : index
    %37 = vector.load %arg2[%c6, %c0_33, %c0_34] : memref<9x8x4xbf16, #tpu.memory_space<vmem>>, vector<1x8x4xbf16>
    %38 = vector.shape_cast %37 : vector<1x8x4xbf16> to vector<8x4xbf16>
    %c0_35 = arith.constant 0 : index
    %c0_36 = arith.constant 0 : index
    %c36 = arith.constant 36 : index
    %39 = vector.load %arg1[%c0_35, %c0_36, %c36] : memref<1x4x512xbf16, #tpu.memory_space<vmem>>, vector<1x4x384xbf16>
    %40 = vector.shape_cast %39 : vector<1x4x384xbf16> to vector<4x384xbf16>
    %cst_37 = arith.constant dense<0.000000e+00> : vector<8x384xf32>
    %41 = tpu.matmul %38, %40, %cst_37 {dimension_numbers = #tpu.dot_dimension_numbers<[1], [0], [0], [1], [0, 0, 1, 1], [], []>} : vector<8x4xbf16>, vector<4x384xbf16>, vector<8x384xf32> -> vector<8x384xf32>
    %42 = arith.addf %36, %41 : vector<8x384xf32>
    %c7 = arith.constant 7 : index
    %c0_38 = arith.constant 0 : index
    %c0_39 = arith.constant 0 : index
    %43 = vector.load %arg2[%c7, %c0_38, %c0_39] : memref<9x8x4xbf16, #tpu.memory_space<vmem>>, vector<1x8x4xbf16>
    %44 = vector.shape_cast %43 : vector<1x8x4xbf16> to vector<8x4xbf16>
    %c0_40 = arith.constant 0 : index
    %c0_41 = arith.constant 0 : index
    %c37 = arith.constant 37 : index
    %45 = vector.load %arg1[%c0_40, %c0_41, %c37] : memref<1x4x512xbf16, #tpu.memory_space<vmem>>, vector<1x4x384xbf16>
    %46 = vector.shape_cast %45 : vector<1x4x384xbf16> to vector<4x384xbf16>
    %cst_42 = arith.constant dense<0.000000e+00> : vector<8x384xf32>
    %47 = tpu.matmul %44, %46, %cst_42 {dimension_numbers = #tpu.dot_dimension_numbers<[1], [0], [0], [1], [0, 0, 1, 1], [], []>} : vector<8x4xbf16>, vector<4x384xbf16>, vector<8x384xf32> -> vector<8x384xf32>
    %48 = arith.addf %42, %47 : vector<8x384xf32>
    %c8 = arith.constant 8 : index
    %c0_43 = arith.constant 0 : index
    %c0_44 = arith.constant 0 : index
    %49 = vector.load %arg2[%c8, %c0_43, %c0_44] : memref<9x8x4xbf16, #tpu.memory_space<vmem>>, vector<1x8x4xbf16>
    %50 = vector.shape_cast %49 : vector<1x8x4xbf16> to vector<8x4xbf16>
    %c0_45 = arith.constant 0 : index
    %c0_46 = arith.constant 0 : index
    %c38 = arith.constant 38 : index
    %51 = vector.load %arg1[%c0_45, %c0_46, %c38] : memref<1x4x512xbf16, #tpu.memory_space<vmem>>, vector<1x4x384xbf16>
    %52 = vector.shape_cast %51 : vector<1x4x384xbf16> to vector<4x384xbf16>
    %cst_47 = arith.constant dense<0.000000e+00> : vector<8x384xf32>
    %53 = tpu.matmul %50, %52, %cst_47 {dimension_numbers = #tpu.dot_dimension_numbers<[1], [0], [0], [1], [0, 0, 1, 1], [], []>} : vector<8x4xbf16>, vector<4x384xbf16>, vector<8x384xf32> -> vector<8x384xf32>
    %54 = arith.addf %48, %53 : vector<8x384xf32>
    %c0_48 = arith.constant 0 : index
    %c0_49 = arith.constant 0 : index
    %55 = vector.load %arg3[%c0_48, %c0_49] : memref<8x1xf32, #tpu.memory_space<vmem>>, vector<8x1xf32>
    %56 = vector.broadcast %55 : vector<8x1xf32> to vector<8x384xf32>
    %57 = arith.addf %54, %56 : vector<8x384xf32>
    %c0_50 = arith.constant 0 : index
    %c0_51 = arith.constant 0 : index
    %c0_52 = arith.constant 0 : index
    %58 = vector.load %arg4[%c0_50, %c0_51, %c0_52] : memref<1x8x384xf32, #tpu.memory_space<vmem>>, vector<1x8x384xf32>
    %59 = vector.shape_cast %58 : vector<1x8x384xf32> to vector<8x384xf32>
    %60 = vector.shape_cast %57 : vector<8x384xf32> to vector<1x8x384xf32>
    tpu.vector_store %arg4[%c0_50, %c0_51, %c0_52], %60 {strides = array<i32>} : memref<1x8x384xf32, #tpu.memory_space<vmem>>, vector<1x8x384xf32>,
    return
  }
  func.func @transform_0(%arg0: i32) -> (i32, i32, i32) {
    %c0_i32 = arith.constant 0 : i32
    %c0_i32_0 = arith.constant 0 : i32
    %c0_i32_1 = arith.constant 0 : i32
    return %arg0, %c0_i32, %c0_i32_0 : i32, i32, i32
  }
  func.func @transform_1(%arg0: i32) -> (i32, i32, i32) {
    %c0_i32 = arith.constant 0 : i32
    %c0_i32_0 = arith.constant 0 : i32
    %c0_i32_1 = arith.constant 0 : i32
    %c0_i32_2 = arith.constant 0 : i32
    return %c0_i32, %c0_i32_0, %c0_i32_1 : i32, i32, i32
  }
  func.func @transform_2(%arg0: i32) -> (i32, i32) {
    %c0_i32 = arith.constant 0 : i32
    %c0_i32_0 = arith.constant 0 : i32
    %c0_i32_1 = arith.constant 0 : i32
    return %c0_i32, %c0_i32_0 : i32, i32
  }
  func.func @transform_3(%arg0: i32) -> (i32, i32, i32) {
    %c0_i32 = arith.constant 0 : i32
    %c0_i32_0 = arith.constant 0 : i32
    %c0_i32_1 = arith.constant 0 : i32
    return %arg0, %c0_i32, %c0_i32_0 : i32, i32, i32
  }
}

</mosaic_0001>

<bundles_post_ra>
// kernel: tpu_custom_call.1
= control target key start
LH: loop header
LB: loop body
LE: loop exit
PB: predicated region body
PF: predicated region fallthrough
CT: control target
= control target key end

     0   :  { %8 = vsyncpa [#allocation3], 0  ;;  %s1890_s0 = inlined_call_operand.vmem [shape: bf16[2,4,512], index: 0, kind: input, shape index: {}]   ;;  %s1891_s1 = inlined_call_operand.vmem [shape: bf16[9,8,4], index: 1, kind: input, shape index: {}]   ;;  %s1892_s2 = inlined_call_operand.vmem [shape: f32[8,1], index: 2, kind: input, shape index: {}]   ;;  %s1893_s3 = inlined_call_operand.hbm [shape: f32[2,8,384], index: 3, kind: output, shape index: {}]  }
   0x1   :  { %10 = vsyncpa [#allocation3 + $0x1], 0  ;;  %s1667_s12 = smov 0   ;;  %s1669_s13 = smov 0  }
   0x2   :  { %s1671_s14 = smov 0   ;;  %s1673_s15 = smov 0  }
   0x3 LB: > { %s1688_s16 = sadd.s32 4294967295, %s1632_s15   ;;  %s1399_s17 = sadd.s32 4294967294, %s1632_s15   ;;  %s1632_s15 = sphi %s1673_s15, %s1899_s15   ;;  %s1628_s14 = sphi %s1671_s14, %s1898_s14   ;;  %s1624_s13 = sphi %s1669_s13, %s1897_s13   ;;  %s1620_s12 = sphi %s1667_s12, %s1896_s12  }
   0x4   : > { %s1692_s18 = sadd.s32 1, %s1632_s15   ;;  %s91_s19 = sadd.s32 1, %s1628_s14 }
   0x5   : > { %s88_s20 = ssub.s32 %s1632_s15, %s1692_s18  ;;  %p101_p0 = scmp.ne.s32.totalorder %s1628_s14, %s1624_s13 }
   0x6   : > { %p89_p1 = scmp.eq.s32.totalorder %s88_s20, 0  ;;  %p102_p2 = scmp.eq.s32.totalorder %s1688_s16, 1 }
   0x7   : > { %p107_p3 = scmp.ne.s32.totalorder %s1624_s13, %s1620_s12  ;;  %p108_p4 = scmp.eq.s32.totalorder %s1399_s17, 1 }
   0x8   : > { %s1703_s21 = scalar_select %p89_p1, %s1628_s14, %s91_s19  }
   0x9   : > { %p1705_p5 = por %p102_p2, %p101_p0  ;;  %p1709_p6 = por %p108_p4, %p107_p3 }
   0xa   : > { %p1402_p7 = scmp.ge.s32.totalorder %s1632_s15, 1  ;;  %p140_p8 = scmp.lt.s32.totalorder %s1632_s15, 3 }
   0xc   : > { %p141_p9 = pnand %p1402_p7, %p140_p8 }
   0xd   : > { %p164_p10 = scmp.lt.s32.totalorder (!%p141_p9), %s1688_s16, 1  ;;  %s1638_s29 = smov (!%p141_p9), 127  }
   0xe   : > { %144 = sbr.rel (%p141_p9) target bundleno = 428 (0x1ac), region = 32  ;;  %s1639_s30 = smov (!%p141_p9), 126  }
   0xf   : > { %s1640_s4 = smov (!%p141_p9), 110   ;;  %s1641_s5 = smov (!%p141_p9), 109  }
  0x10   : > { %s1642_s6 = smov (!%p141_p9), 108   ;;  %s1643_s7 = smov (!%p141_p9), 92  }
  0x11   : > { %s1644_s8 = smov (!%p141_p9), 91   ;;  %s1645_s9 = smov (!%p141_p9), 90  }
  0x12   : > { %s161_s17 = sand.u32 (!%p141_p9), 1, %s1624_s13   ;;  %s1517_s20 = smul.u32 (!%p141_p9), 384, %s1688_s16 }
  0x13   : > { %v180_v0 = vlaneseq  ;;  %v1634_v1 = vmov 1983009808   ;;  %s165_s24 = scalar_select %p164_p10, %s1688_s16, 1  ;;  %v1635_v5 = vmov 0.0   ;;  %v1636_v6 = vmov 0   ;;  %v1313_v18 = vld [vmem:[%s1892_s2] sm:$0xff] }
  0x14   : > { %v178_v2 = vunpack.c.l.s4 %v1634_v1  ;;  %1462 = vmatprep.subr.bf16.mxu1 %v1635_v5  ;;  %251 = vmatprep.mubr.bf16.mxu0 %v1636_v6  ;;  %vm1637_vm0 = vmmov 0   ;;  %vm201_vm1 = vcmask 1039360   ;;  %vm209_vm2 = vcmask 1041408   ;;  %v1405_v28 = vld [vmem:[%s1891_s1 + $0x4] sm:$0xf]  ;;  %s1516_s19 = smul.u32 24, %s161_s17 }
  0x15   : > { %v181_v3 = vshrl.u32 %v180_v0, 7  ;;  %s1443_s25 = sshll.u32 %s165_s24, 3  ;;  %1569 = vset.pattern.permute.xlu0 %v1636_v6  ;;  %1464 = vmatprep.mubr.msk.bf16.mxu1 %vm1637_vm0, %v1635_v5  ;;  %vm205_vm3 = vcmask 31744   ;;  %vm439_vm4 = vcmask 1031168   ;;  %v170_v39 = vld [vmem:[%s1891_s1] sm:$0xf] }
  0x16   : > { %v179_v4 = vunpack.c.0.s8 %v178_v2  ;;  %s168_s28 = scalar_lea.vmem %s1890_s0, %s1443_s25  ;;  %vm568_vm5 = vcmask 900096   ;;  %v1412_v49 = vld [vmem:[%s1891_s1 + $0x8] sm:$0xf]  ;;  %vm697_vm6 = vcmask 891904   ;;  %v1416_v59 = vld [vmem:[%s1891_s1 + $0xc] sm:$0xf] }
  0x17   : > { %v174_v8 = vld [vmem:[%s168_s28] sm:$0xff]  ;;  %vm826_vm7 = vcmask 883712   ;;  %vm955_vm8 = vcmask 752640   ;;  %vm1084_vm9 = vcmask 744448   ;;  %vm1213_vm10 = vcmask 736256   ;;  %s163_s24 = scalar_lea.vmem [#allocation2], %s1516_s19 }
  0x18   : > { %v182_v7 = vsub.s32 %v179_v4, %v181_v3  ;;  %v171_v9 = vld [vmem:[%s168_s28] sm:$0x3f]  ;;  %v176_v11 = vcombine.high %v174_v8, %v174_v8  ;;  %s1340_s25 = sshll.u32 %s163_s24, 4  ;;  %s1847_s28 = scalar_lea.hbm %s1893_s3, %s1517_s20  ;;  %s1849_s25 = int_to_ptr.vmem [resolvable:$true] %s1340_s25 }
  0x19   : > { %v301_v13 = vcombine.high %v171_v9, %v171_v9  ;;  %s1326_s16 = scalar_lea.sflag [#allocation3], %s161_s17 }
  0x1a   : > { %v183_v10 = vrot.slane %v174_v8, %v182_v7  ;;  %v1725_v12 = vrot.slane %v171_v9, %v182_v7  ;;  %v190_v15 = vrot.slane %v176_v11, %v182_v7 }
  0x1b   : > { %v1727_v16 = vrot.slane %v301_v13, %v182_v7  ;;  %v1420_v7 = vld [vmem:[%s1891_s1 + $0x10] sm:$0xf] }
  0x1c   : > { %193 = vrot.lane.b32.xlu0 %v183_v10, %s1638_s29  ;;  %v191_v14 = vcombine.high %v183_v10, %v183_v10  ;;  %197 = vrot.lane.b32.xlu1 %v190_v15, %s1638_s29  ;;  %v192_v17 = vcombine.high %v190_v15, %v190_v15  ;;  %v316_v22 = vcombine.high %v1725_v12, %v1725_v12  ;;  %v321_v31 = vsel %vm209_vm2, %v1725_v12, 0 }
  0x1d   : > { %v327_v33 = vsel %vm209_vm2, %v1727_v16, 0 }
  0x20   : > { %195 = vrot.lane.b32.xlu0 %v191_v14, %s1638_s29  ;;  %199 = vrot.lane.b32.xlu1 %v192_v17, %s1638_s29  ;;  %s1572_s29 = scalar_lea.vmem %s1849_s25, 384 }
  0x21   : > { %p1573_p11 = scmp.ne.s32.totalorder %s1849_s25, %s1572_s29 }
  0x23   : > { %p1574_p12 = pnand %p1573_p11, %p1705_p5 }
  0x24   : > { %431 = vrot.lane.b32.xlu0 %v183_v10, %s1639_s30  ;;  %433 = vrot.lane.b32.xlu1 %v191_v14, %s1639_s30 }
  0x25   : > { %p1575_p13 = pneg %p1574_p12 }
  0x28   : > { %435 = vrot.lane.b32.xlu0 %v190_v15, %s1639_s30  ;;  %437 = vrot.lane.b32.xlu1 %v192_v17, %s1639_s30  ;;  %s1646_s30 = smov [#allocation2]  }
  0x2c   : > { %560 = vrot.lane.b32.xlu0 %v183_v10, %s1640_s4  ;;  %562 = vrot.lane.b32.xlu1 %v191_v14, %s1640_s4 }
  0x30   : > { %564 = vrot.lane.b32.xlu0 %v190_v15, %s1640_s4  ;;  %566 = vrot.lane.b32.xlu1 %v192_v17, %s1640_s4  ;;  %s1576_s4 = sshll.u32 %s1646_s30, 4  ;;  %s1577_s4 = int_to_ptr.vmem [resolvable:$false] %s1576_s4 }
  0x31   : > { %p1579_p0 = scmp.lt.s32.totalorder %s1849_s25, %s1577_s4 }
  0x34   : > { %689 = vrot.lane.b32.xlu0 %v183_v10, %s1641_s5  ;;  %691 = vrot.lane.b32.xlu1 %v191_v14, %s1641_s5 }
  0x38   : > { %693 = vrot.lane.b32.xlu0 %v190_v15, %s1641_s5  ;;  %695 = vrot.lane.b32.xlu1 %v192_v17, %s1641_s5  ;;  %s1578_s5 = scalar_lea.vmem %s1577_s4, 768 }
  0x39   : > { %p1580_p1 = scmp.lt.s32.totalorder %s1578_s5, %s1572_s29 }
  0x3b   : > { %p1581_p2 = por %p1580_p1, %p1579_p0 }
  0x3c   : > { %818 = vrot.lane.b32.xlu0 %v183_v10, %s1642_s6  ;;  %820 = vrot.lane.b32.xlu1 %v191_v14, %s1642_s6 }
  0x3d   : > { %p1582_p3 = pnand %p1581_p2, %p1575_p13 }
  0x40   : > { %822 = vrot.lane.b32.xlu0 %v190_v15, %s1642_s6  ;;  %824 = vrot.lane.b32.xlu1 %v192_v17, %s1642_s6 }
  0x44   : > { %947 = vrot.lane.b32.xlu0 %v183_v10, %s1643_s7  ;;  %949 = vrot.lane.b32.xlu1 %v191_v14, %s1643_s7 }
  0x48   : > { %951 = vrot.lane.b32.xlu0 %v190_v15, %s1643_s7  ;;  %953 = vrot.lane.b32.xlu1 %v192_v17, %s1643_s7 }
  0x4c   : > { %1076 = vrot.lane.b32.xlu0 %v183_v10, %s1644_s8  ;;  %1078 = vrot.lane.b32.xlu1 %v191_v14, %s1644_s8 }
  0x50   : > { %1080 = vrot.lane.b32.xlu0 %v190_v15, %s1644_s8  ;;  %1082 = vrot.lane.b32.xlu1 %v192_v17, %s1644_s8 }
  0x54   : > { %1205 = vrot.lane.b32.xlu0 %v183_v10, %s1645_s9  ;;  %1207 = vrot.lane.b32.xlu1 %v191_v14, %s1645_s9 }
  0x58   : > { %1209 = vrot.lane.b32.xlu0 %v190_v15, %s1645_s9  ;;  %1211 = vrot.lane.b32.xlu1 %v192_v17, %s1645_s9  ;;  %v1424_v17 = vld [vmem:[%s1891_s1 + $0x14] sm:$0xf] }
  0x5c   : > { %1316 = vperm.xlu0 %1569, %v1313_v18  }
  0x8e   : > { %v194_v19 = vpop.permute.xlu0 %193  ;;  %v198_v20 = vpop.permute.xlu1 %197 }
  0x92   : > { %v196_v21 = vpop.permute.xlu0 %195  ;;  %v200_v25 = vpop.permute.xlu1 %199 }
  0x93   : > { %v203_v23 = vsel %vm201_vm1, %v196_v21, %v198_v20  ;;  %v202_v24 = vsel %vm201_vm1, %v194_v19, %v196_v21  ;;  %v204_v27 = vsel %vm201_vm1, %v198_v20, %v200_v25 }
  0x94   : > { %1406 = vmatprep.subr.msk.bf16.mxu0 %vm209_vm2, %v203_v23  ;;  %v211_v26 = vsel %vm209_vm2, %v202_v24, 0  ;;  %v217_v29 = vsel %vm209_vm2, %v204_v27, 0  ;;  %v1428_v27 = vld [vmem:[%s1891_s1 + $0x18] sm:$0xf] }
  0x95   : > { %234 = vmatpush1.bf16.msra.mxu0 %v211_v26  ;;  %1463 = vmatpush3.bf16.msra.mxu1 %v217_v29 }
  0x96   : > { %v432_v30 = vpop.permute.xlu0 %431  ;;  %1409 = vmatprep.subr.msk.bf16.mxu0 %vm209_vm2, %v316_v22  ;;  %1468 = vmatprep.subr.bf16.mxu1 %v1635_v5  ;;  %v434_v32 = vpop.permute.xlu1 %433 }
  0x97   : > { %v440_v35 = vsel %vm439_vm4, %v432_v30, %v434_v32 }
  0x98   : > { %1407 = vmatmul.mubr.msk.bf16.vlgmr.msra.gmra.mxu0 %vm205_vm3, %v1405_v28  ;;  %1465 = vmatmul.mubr.msk.bf16.vlgmr.msra.gmra.mxu1 %vm205_vm3, %v1405_v28  ;;  %v447_v40 = vsel %vm209_vm2, %v440_v35, 0 }
  0x99   : > { %344 = vmatpush1.bf16.msra.mxu0 %v321_v31  ;;  %361 = vmatprep.mubr.bf16.mxu0 %v1636_v6 }
  0x9a   : > { %v436_v34 = vpop.permute.xlu0 %435  ;;  %1469 = vmatpush3.bf16.msra.mxu1 %v327_v33  ;;  %1470 = vmatprep.mubr.msk.bf16.mxu1 %vm1637_vm0, %v1635_v5  ;;  %v438_v37 = vpop.permute.xlu1 %437 }
  0x9b   : > { %v441_v36 = vsel %vm439_vm4, %v434_v32, %v436_v34  ;;  %1474 = vmatprep.subr.bf16.mxu1 %v1635_v5  ;;  %v442_v38 = vsel %vm439_vm4, %v436_v34, %v438_v37  ;;  %v1432_v37 = vld [vmem:[%s1891_s1 + $0x1c] sm:$0xf] }
  0x9c   : > { %1413 = vmatprep.subr.msk.bf16.mxu0 %vm209_vm2, %v441_v36  ;;  %v453_v42 = vsel %vm209_vm2, %v442_v38, 0 }
  0x9e   : > { %v561_v41 = vpop.permute.xlu0 %560  ;;  %v563_v43 = vpop.permute.xlu1 %562 }
  0x9f   : > { %v569_v45 = vsel %vm568_vm5, %v561_v41, %v563_v43 }
  0xa0   : > { %1410 = vmatmul.mubr.msk.bf16.vlgmr.msra.gmra.mxu0 %vm205_vm3, %v170_v39  ;;  %1471 = vmatmul.mubr.msk.bf16.vlgmr.msra.gmra.mxu1 %vm205_vm3, %v170_v39  ;;  %v576_v50 = vsel %vm209_vm2, %v569_v45, 0 }
  0xa1   : > { %470 = vmatpush1.bf16.msra.mxu0 %v447_v40  ;;  %487 = vmatprep.mubr.bf16.mxu0 %v1636_v6  ;;  %v1436_v40 = vld [vmem:[%s1891_s1 + $0x20] sm:$0xf] }
  0xa2   : > { %v565_v44 = vpop.permute.xlu0 %564  ;;  %1475 = vmatpush3.bf16.msra.mxu1 %v453_v42  ;;  %1476 = vmatprep.mubr.msk.bf16.mxu1 %vm1637_vm0, %v1635_v5  ;;  %v567_v47 = vpop.permute.xlu1 %566 }
  0xa3   : > { %v570_v46 = vsel %vm568_vm5, %v563_v43, %v565_v44  ;;  %1480 = vmatprep.subr.bf16.mxu1 %v1635_v5  ;;  %v571_v48 = vsel %vm568_vm5, %v565_v44, %v567_v47 }
  0xa4   : > { %1417 = vmatprep.subr.msk.bf16.mxu0 %vm209_vm2, %v570_v46  ;;  %v582_v52 = vsel %vm209_vm2, %v571_v48, 0 }
  0xa6   : > { %v690_v51 = vpop.permute.xlu0 %689  ;;  %v692_v53 = vpop.permute.xlu1 %691 }
  0xa7   : > { %v698_v55 = vsel %vm697_vm6, %v690_v51, %v692_v53 }
  0xa8   : > { %1414 = vmatmul.mubr.msk.bf16.vlgmr.msra.gmra.mxu0 %vm205_vm3, %v1412_v49  ;;  %1477 = vmatmul.mubr.msk.bf16.vlgmr.msra.gmra.mxu1 %vm205_vm3, %v1412_v49  ;;  %v705_v60 = vsel %vm209_vm2, %v698_v55, 0 }
  0xa9   : > { %599 = vmatpush1.bf16.msra.mxu0 %v576_v50  ;;  %616 = vmatprep.mubr.bf16.mxu0 %v1636_v6 }
  0xaa   : > { %v694_v54 = vpop.permute.xlu0 %693  ;;  %1481 = vmatpush3.bf16.msra.mxu1 %v582_v52  ;;  %1482 = vmatprep.mubr.msk.bf16.mxu1 %vm1637_vm0, %v1635_v5  ;;  %v696_v57 = vpop.permute.xlu1 %695 }
  0xab   : > { %v699_v56 = vsel %vm697_vm6, %v692_v53, %v694_v54  ;;  %1486 = vmatprep.subr.bf16.mxu1 %v1635_v5  ;;  %v700_v58 = vsel %vm697_vm6, %v694_v54, %v696_v57 }
  0xac   : > { %1421 = vmatprep.subr.msk.bf16.mxu0 %vm209_vm2, %v699_v56  ;;  %v711_v62 = vsel %vm209_vm2, %v700_v58, 0 }
  0xae   : > { %v819_v61 = vpop.permute.xlu0 %818  ;;  %v821_v63 = vpop.permute.xlu1 %820 }
  0xaf   : > { %v827_v1 = vsel %vm826_vm7, %v819_v61, %v821_v63 }
  0xb0   : > { %1418 = vmatmul.mubr.msk.bf16.vlgmr.msra.gmra.mxu0 %vm205_vm3, %v1416_v59  ;;  %1483 = vmatmul.mubr.msk.bf16.vlgmr.msra.gmra.mxu1 %vm205_vm3, %v1416_v59  ;;  %v834_v8 = vsel %vm209_vm2, %v827_v1, 0 }
  0xb1   : > { %728 = vmatpush1.bf16.msra.mxu0 %v705_v60  ;;  %745 = vmatprep.mubr.bf16.mxu0 %v1636_v6 }
  0xb2   : > { %v823_v0 = vpop.permute.xlu0 %822  ;;  %1487 = vmatpush3.bf16.msra.mxu1 %v711_v62  ;;  %1488 = vmatprep.mubr.msk.bf16.mxu1 %vm1637_vm0, %v1635_v5  ;;  %v825_v3 = vpop.permute.xlu1 %824 }
  0xb3   : > { %v828_v2 = vsel %vm826_vm7, %v821_v63, %v823_v0  ;;  %1492 = vmatprep.subr.bf16.mxu1 %v1635_v5  ;;  %v829_v4 = vsel %vm826_vm7, %v823_v0, %v825_v3 }
  0xb4   : > { %1425 = vmatprep.subr.msk.bf16.mxu0 %vm209_vm2, %v828_v2  ;;  %v840_v10 = vsel %vm209_vm2, %v829_v4, 0 }
  0xb6   : > { %v948_v9 = vpop.permute.xlu0 %947  ;;  %v950_v11 = vpop.permute.xlu1 %949 }
  0xb7   : > { %v956_v13 = vsel %vm955_vm8, %v948_v9, %v950_v11 }
  0xb8   : > { %1422 = vmatmul.mubr.msk.bf16.vlgmr.msra.gmra.mxu0 %vm205_vm3, %v1420_v7  ;;  %1489 = vmatmul.mubr.msk.bf16.vlgmr.msra.gmra.mxu1 %vm205_vm3, %v1420_v7  ;;  %v963_v18 = vsel %vm209_vm2, %v956_v13, 0 }
  0xb9   : > { %857 = vmatpush1.bf16.msra.mxu0 %v834_v8  ;;  %874 = vmatprep.mubr.bf16.mxu0 %v1636_v6 }
  0xba   : > { %v952_v12 = vpop.permute.xlu0 %951  ;;  %1493 = vmatpush3.bf16.msra.mxu1 %v840_v10  ;;  %1494 = vmatprep.mubr.msk.bf16.mxu1 %vm1637_vm0, %v1635_v5  ;;  %v954_v15 = vpop.permute.xlu1 %953 }
  0xbb   : > { %v957_v14 = vsel %vm955_vm8, %v950_v11, %v952_v12  ;;  %1498 = vmatprep.subr.bf16.mxu1 %v1635_v5  ;;  %v958_v16 = vsel %vm955_vm8, %v952_v12, %v954_v15 }
  0xbc   : > { %1429 = vmatprep.subr.msk.bf16.mxu0 %vm209_vm2, %v957_v14  ;;  %v969_v20 = vsel %vm209_vm2, %v958_v16, 0 }
  0xbe   : > { %v1077_v19 = vpop.permute.xlu0 %1076  ;;  %v1079_v21 = vpop.permute.xlu1 %1078 }
  0xbf   : > { %v1085_v23 = vsel %vm1084_vm9, %v1077_v19, %v1079_v21 }
  0xc0   : > { %1426 = vmatmul.mubr.msk.bf16.vlgmr.msra.gmra.mxu0 %vm205_vm3, %v1424_v17  ;;  %1495 = vmatmul.mubr.msk.bf16.vlgmr.msra.gmra.mxu1 %vm205_vm3, %v1424_v17  ;;  %v1092_v28 = vsel %vm209_vm2, %v1085_v23, 0 }
  0xc1   : > { %986 = vmatpush1.bf16.msra.mxu0 %v963_v18  ;;  %1003 = vmatprep.mubr.bf16.mxu0 %v1636_v6 }
  0xc2   : > { %v1081_v22 = vpop.permute.xlu0 %1080  ;;  %1499 = vmatpush3.bf16.msra.mxu1 %v969_v20  ;;  %1500 = vmatprep.mubr.msk.bf16.mxu1 %vm1637_vm0, %v1635_v5  ;;  %v1083_v25 = vpop.permute.xlu1 %1082 }
  0xc3   : > { %v1086_v24 = vsel %vm1084_vm9, %v1079_v21, %v1081_v22  ;;  %1504 = vmatprep.subr.bf16.mxu1 %v1635_v5  ;;  %v1087_v26 = vsel %vm1084_vm9, %v1081_v22, %v1083_v25 }
  0xc4   : > { %1433 = vmatprep.subr.msk.bf16.mxu0 %vm209_vm2, %v1086_v24  ;;  %v1098_v30 = vsel %vm209_vm2, %v1087_v26, 0 }
  0xc6   : > { %v1206_v29 = vpop.permute.xlu0 %1205  ;;  %v1208_v31 = vpop.permute.xlu1 %1207 }
  0xc7   : > { %v1214_v33 = vsel %vm1213_vm10, %v1206_v29, %v1208_v31 }
  0xc8   : > { %1430 = vmatmul.mubr.msk.bf16.vlgmr.msra.gmra.mxu0 %vm205_vm3, %v1428_v27  ;;  %1501 = vmatmul.mubr.msk.bf16.vlgmr.msra.gmra.mxu1 %vm205_vm3, %v1428_v27  ;;  %v1221_v38 = vsel %vm209_vm2, %v1214_v33, 0 }
  0xc9   : > { %1115 = vmatpush1.bf16.msra.mxu0 %v1092_v28  ;;  %1132 = vmatprep.mubr.bf16.mxu0 %v1636_v6 }
  0xca   : > { %v1210_v32 = vpop.permute.xlu0 %1209  ;;  %1505 = vmatpush3.bf16.msra.mxu1 %v1098_v30  ;;  %1506 = vmatprep.mubr.msk.bf16.mxu1 %vm1637_vm0, %v1635_v5  ;;  %v1212_v35 = vpop.permute.xlu1 %1211 }
  0xcb   : > { %v1215_v34 = vsel %vm1213_vm10, %v1208_v31, %v1210_v32  ;;  %1510 = vmatprep.subr.bf16.mxu1 %v1635_v5  ;;  %v1216_v36 = vsel %vm1213_vm10, %v1210_v32, %v1212_v35 }
  0xcc   : > { %1437 = vmatprep.subr.msk.bf16.mxu0 %vm209_vm2, %v1215_v34  ;;  %v1227_v39 = vsel %vm209_vm2, %v1216_v36, 0 }
  0xd0   : > { %1434 = vmatmul.mubr.msk.bf16.vlgmr.msra.gmra.mxu0 %vm205_vm3, %v1432_v37  ;;  %1507 = vmatmul.mubr.msk.bf16.vlgmr.msra.gmra.mxu1 %vm205_vm3, %v1432_v37 }
  0xd1   : > { %1244 = vmatpush1.bf16.msra.mxu0 %v1221_v38  ;;  %1261 = vmatprep.mubr.bf16.mxu0 %v1636_v6 }
  0xd2   : > { %1511 = vmatpush3.bf16.msra.mxu1 %v1227_v39  ;;  %1512 = vmatprep.mubr.msk.bf16.mxu1 %vm1637_vm0, %v1635_v5 }
  0xd8   : > { %1438 = vmatmul.mubr.msk.bf16.vlgmr.msra.gmra.mxu0 %vm205_vm3, %v1436_v40  ;;  %1513 = vmatmul.mubr.msk.bf16.vlgmr.msra.gmra.mxu1 %vm205_vm3, %v1436_v40 }
 0x158   : > { %v253_v41 = vpop.f32.mrf.mxu0  ;;  %v294_v43 = vpop.f32.mrf.mxu1 }
 0x15a   : > { %v255_v42 = vpop.f32.mrf.mxu0  ;;  %v1466_v45 = vpop.f32.mrf.mxu1 }
 0x15c   : > { %v257_v44 = vpop.f32.mrf.mxu0  ;;  %v297_v46 = vpop.f32.mrf.mxu1 }
 0x15e   : > { %v258_v6 = vpop.f32.mrf.mxu0  ;;  %v1467_v47 = vpop.f32.mrf.mxu1 }
 0x160   : > { %v363_v48 = vpop.f32.mrf.mxu0  ;;  %v404_v50 = vpop.f32.mrf.mxu1 }
 0x161   : > { %v364_v28 = vadd.f32 %v363_v48, %v253_v41  ;;  %v405_v32 = vadd.f32 %v404_v50, %v294_v43 }
 0x162   : > { %v365_v49 = vpop.f32.mrf.mxu0  ;;  %v1472_v51 = vpop.f32.mrf.mxu1 }
 0x163   : > { %v366_v31 = vadd.f32 %v365_v49, %v255_v42 }
 0x164   : > { %v367_v5 = vpop.f32.mrf.mxu0  ;;  %v407_v53 = vpop.f32.mrf.mxu1 }
 0x166   : > { %v368_v52 = vpop.f32.mrf.mxu0  ;;  %v1473_v54 = vpop.f32.mrf.mxu1 }
 0x168   : > { %v489_v55 = vpop.f32.mrf.mxu0  ;;  %v530_v57 = vpop.f32.mrf.mxu1 }
 0x169   : > { %v536_v33 = vadd.f32 %v489_v55, %v364_v28  ;;  %v538_v37 = vadd.f32 %v530_v57, %v405_v32  ;;  %v1317_v57 = vpop.permute.xlu0 %1316 }
 0x16a   : > { %v491_v56 = vpop.f32.mrf.mxu0  ;;  %v1478_v59 = vpop.f32.mrf.mxu1 }
 0x16b   : > { %v537_v36 = vadd.f32 %v491_v56, %v366_v31 }
 0x16c   : > { %v493_v58 = vpop.f32.mrf.mxu0  ;;  %v533_v61 = vpop.f32.mrf.mxu1 }
 0x16e   : > { %v494_v60 = vpop.f32.mrf.mxu0  ;;  %v1479_v62 = vpop.f32.mrf.mxu1 }
 0x170   : > { %v618_v63 = vpop.f32.mrf.mxu0  ;;  %v659_v1 = vpop.f32.mrf.mxu1 }
 0x171   : > { %v665_v38 = vadd.f32 %v618_v63, %v536_v33  ;;  %v667_v45 = vadd.f32 %v659_v1, %v538_v37 }
 0x172   : > { %v620_v0 = vpop.f32.mrf.mxu0  ;;  %v1484_v3 = vpop.f32.mrf.mxu1 }
 0x173   : > { %v666_v44 = vadd.f32 %v620_v0, %v537_v36 }
 0x174   : > { %v622_v2 = vpop.f32.mrf.mxu0  ;;  %v662_v7 = vpop.f32.mrf.mxu1 }
 0x176   : > { %v623_v4 = vpop.f32.mrf.mxu0  ;;  %v1485_v8 = vpop.f32.mrf.mxu1 }
 0x178   : > { %v747_v9 = vpop.f32.mrf.mxu0  ;;  %v788_v11 = vpop.f32.mrf.mxu1 }
 0x179   : > { %v794_v6 = vadd.f32 %v747_v9, %v665_v38  ;;  %v796_v48 = vadd.f32 %v788_v11, %v667_v45 }
 0x17a   : > { %v749_v10 = vpop.f32.mrf.mxu0  ;;  %v1490_v13 = vpop.f32.mrf.mxu1 }
 0x17b   : > { %v795_v41 = vadd.f32 %v749_v10, %v666_v44 }
 0x17c   : > { %v751_v12 = vpop.f32.mrf.mxu0  ;;  %v791_v15 = vpop.f32.mrf.mxu1 }
 0x17e   : > { %v752_v14 = vpop.f32.mrf.mxu0  ;;  %v1491_v16 = vpop.f32.mrf.mxu1 }
 0x180   : > { %v876_v17 = vpop.f32.mrf.mxu0  ;;  %v917_v19 = vpop.f32.mrf.mxu1 }
 0x181   : > { %v923_v5 = vadd.f32 %v876_v17, %v794_v6  ;;  %v925_v50 = vadd.f32 %v917_v19, %v796_v48 }
 0x182   : > { %v878_v18 = vpop.f32.mrf.mxu0  ;;  %v1496_v21 = vpop.f32.mrf.mxu1 }
 0x183   : > { %v924_v49 = vadd.f32 %v878_v18, %v795_v41 }
 0x184   : > { %v880_v20 = vpop.f32.mrf.mxu0  ;;  %v920_v23 = vpop.f32.mrf.mxu1 }
 0x186   : > { %v881_v22 = vpop.f32.mrf.mxu0  ;;  %v1497_v24 = vpop.f32.mrf.mxu1 }
 0x188   : > { %v1005_v25 = vpop.f32.mrf.mxu0  ;;  %v1046_v27 = vpop.f32.mrf.mxu1 }
 0x189   : > { %v1052_v51 = vadd.f32 %v1005_v25, %v923_v5  ;;  %v1054_v55 = vadd.f32 %v1046_v27, %v925_v50 }
 0x18a   : > { %v1007_v26 = vpop.f32.mrf.mxu0  ;;  %v1502_v30 = vpop.f32.mrf.mxu1 }
 0x18b   : > { %v1053_v54 = vadd.f32 %v1007_v26, %v924_v49 }
 0x18c   : > { %v1009_v29 = vpop.f32.mrf.mxu0  ;;  %v1049_v35 = vpop.f32.mrf.mxu1 }
 0x18e   : > { %v1010_v34 = vpop.f32.mrf.mxu0  ;;  %v1503_v39 = vpop.f32.mrf.mxu1 }
 0x190   : > { %v1134_v40 = vpop.f32.mrf.mxu0  ;;  %v1175_v47 = vpop.f32.mrf.mxu1 }
 0x191   : > { %v1181_v56 = vadd.f32 %v1134_v40, %v1052_v51  ;;  %v1183_v61 = vadd.f32 %v1175_v47, %v1054_v55 }
 0x192   : > { %v1136_v46 = vpop.f32.mrf.mxu0  ;;  %v1508_v43 = vpop.f32.mrf.mxu1 }
 0x193   : > { %v1182_v60 = vadd.f32 %v1136_v46, %v1053_v54 }
 0x194   : > { %v1138_v42 = vpop.f32.mrf.mxu0  ;;  %v1178_v53 = vpop.f32.mrf.mxu1 }
 0x196   : > { %v1139_v52 = vpop.f32.mrf.mxu0  ;;  %v1509_v58 = vpop.f32.mrf.mxu1 }
 0x198   : > { %v1263_v59 = vpop.f32.mrf.mxu0  ;;  %v1304_v0 = vpop.f32.mrf.mxu1 }
 0x199   : > { %v1310_v62 = vadd.f32 %v1263_v59, %v1181_v56  ;;  %v1312_v3 = vadd.f32 %v1304_v0, %v1183_v61 }
 0x19a   : > { %v1265_v63 = vpop.f32.mrf.mxu0  ;;  %v1514_v7 = vpop.f32.mrf.mxu1 }
 0x19b   : > { %v1319_v1 = vadd.f32 %v1317_v57, %v1310_v62  ;;  %v1311_v2 = vadd.f32 %v1265_v63, %v1182_v60  ;;  %v1321_v9 = vadd.f32 %v1317_v57, %v1312_v3 }
 0x19c   : > { %v1267_v4 = vpop.f32.mrf.mxu0  ;;  %v1307_v11 = vpop.f32.mrf.mxu1 }
 0x19d   : > { %1322 = vst [vmem:[%s163_s24] sm:$0xff] %v1319_v1  ;;  %v1320_v8 = vadd.f32 %v1317_v57, %v1311_v2  ;;  %1324 = vst [vmem:[%s163_s24 + $0x10] sm:$0xff] %v1321_v9 }
 0x19e   : > { %v1268_v10 = vpop.f32.mrf.mxu0  ;;  %v1515_v12 = vpop.f32.mrf.mxu1 }
 0x19f   : > { %1323 = vst [vmem:[%s163_s24 + $0x8] sm:$0xff] %v1320_v8 }
 0x1a0   : > { %1585 = shalt.err (!%p1582_p3)
}
 0x1a1   : > { %s1586_s6 = scalar_lea.hbm %s1847_s28, 384  ;;  %s1590_s9 = scalar_lea.hbm %s1893_s3, 768 }
 0x1a2   : > { %p1587_p4 = scmp.ne.s32.totalorder %s1847_s28, %s1586_s6  ;;  %p1591_p9 = scmp.lt.s32.totalorder %s1847_s28, %s1893_s3 }
 0x1a3   : > { %p1592_p10 = scmp.lt.s32.totalorder %s1590_s9, %s1586_s6 }
 0x1a4   : > { %p1588_p7 = pnand %p1587_p4, %p1705_p5 }
 0x1a5   : > { %p1593_p11 = por %p1592_p10, %p1591_p9 }
 0x1a6   : > { %p1589_p8 = pneg %p1588_p7 }
 0x1a8   : > { %p1594_p12 = pnand %p1593_p11, %p1589_p8 }
 0x1aa   : > { %1597 = shalt.err (!%p1594_p12)
}
 0x1ab   : > { %1518 = dma.vmem_to_hbm [thread:$0]  (%p1705_p5), %s1849_s25, 384, %s1847_s28, %s1326_s16  }
 0x1ac PF: > { %p1524_p13 = scmp.ge.s32.totalorder %s1632_s15, 2  ;;  %s1352_s17 = sand.u32 1, %s1620_s12  }
 0x1ad   : > { %s1353_s19 = scalar_lea.sflag [#allocation3], %s1352_s17 }
 0x1ae   : > { %p1521_p0 = pnand %p1524_p13, %p1709_p6 }
 0x1b0   : > { %p1522_p1 = pneg %p1521_p0 }
 0x1b2   : > { %1615 = dma.done.wait (%p1522_p1), %s1353_s19, 384  }
 0x1b3   : > { %1617 = vsyncadd (%p1522_p1), %s1353_s19, 4294966912  ;;  %p13_p2 = scmp.ge.s32.totalorder %s1692_s18, 4   ;;  %s1896_s12 = smov %s1624_s13 }
 0x1b4   : > { %s1897_s13 = smov %s1628_s14  ;;  %s1898_s14 = smov %s1703_s21 }
 0x1b5   : > { %s1899_s15 = smov %s1692_s18  ;;  %15 = sbr.rel (!%p13_p2) target bundleno = 3 (0x3), region = 75 }
 0x1ba   :  { %1358 = vsyncpa [#allocation3], 1 }
 0x1bb   :  { %1360 = vsyncpa [#allocation3 + $0x1], 1 }

</bundles_post_ra>
